<compile_context>
chip_gen: v7x
topology: tpu7x:2x2x1
jax: 0.10.0
libtpu: 0.0.40
codegen_flags: <defaults>
</compile_context>

<pallas_src>
import functools

import jax
import jax.numpy as jnp
from jax import lax
from jax.experimental import pallas as pl
from jax.experimental.pallas import tpu as pltpu

LN_EPS = 1e-5


def _round_up(n, m):
    return -(-n // m) * m


def _vmem_capacity_bytes():
    """Per-TensorCore VMEM capacity; conservative 64 MiB (v7x) fallback."""
    try:
        info = pltpu.get_tpu_info()
        for name in ("vmem_capacity_bytes", "vmem_bytes", "vmem_size_bytes"):
            cap = getattr(info, name, None)
            if cap:
                return int(cap)
    except Exception:
        pass
    return 64 << 20


def _layernorm(z, gamma, beta, apply_affine, inv_n):
    # Fused statistics: two *independent* cross-lane reductions, biased
    # variance via E[x^2] - mu^2.  Padded lanes of z are exactly zero, so
    # dividing by the real feature count (inv_n) gives masked statistics.
    s1 = jnp.sum(z, axis=-1, keepdims=True)
    s2 = jnp.sum(z * z, axis=-1, keepdims=True)
    mu = s1 * inv_n
    var = jnp.maximum(s2 * inv_n - mu * mu, 0.0)
    y = (z - mu) * lax.rsqrt(var + LN_EPS)
    if apply_affine:
        y = y * gamma + beta
    return y


def _bronet_kernel(layers_per_step, n_layer_steps, unroll, apply_affine,
                   apply_bias, inv_h, compute_dtype,
                   x_ref, wp_ref, pp_ref, w1_ref, w2_ref, lp_ref,
                   wf_ref, bf_ref, o_ref, h_ref):
    cdt = compute_dtype
    s = pl.program_id(1)

    # --- projection: Linear -> LayerNorm -> ReLU (first layer step only) -----
    @pl.when(s == 0)
    def _():
        pp = pp_ref[...]                                  # (3, Hp): bias, gamma, beta
        z = jnp.dot(x_ref[...], wp_ref[...], preferred_element_type=jnp.float32)
        if apply_bias:
            z = z + pp[0:1]
        z = _layernorm(z, pp[1:2], pp[2:3], apply_affine, inv_h)
        h_ref[...] = jnp.maximum(z, 0.0)

    def block(h, w1, w2, lp):
        # lp: (6, Hp) = [b1, g1, be1, b2, g2, be2]
        y = jnp.dot(h.astype(cdt), w1, preferred_element_type=jnp.float32)
        if apply_bias:
            y = y + lp[0:1]
        y = jnp.maximum(_layernorm(y, lp[1:2], lp[2:3], apply_affine, inv_h), 0.0)
        y = jnp.dot(y.astype(cdt), w2, preferred_element_type=jnp.float32)
        if apply_bias:
            y = y + lp[3:4]
        y = _layernorm(y, lp[4:5], lp[5:6], apply_affine, inv_h)
        return h + y

    h = h_ref[...]
    if unroll or layers_per_step <= 1:
        for j in range(layers_per_step):
            h = block(h, w1_ref[j], w2_ref[j], lp_ref[j])
    else:
        def body(j, hh):
            return block(hh, w1_ref[j], w2_ref[j], lp_ref[j])
        h = lax.fori_loop(0, layers_per_step, body, h, unroll=2)
    h_ref[...] = h

    # --- final linear (last layer step only) ----------------------------------
    @pl.when(s == n_layer_steps - 1)
    def _():
        o = jnp.dot(h.astype(cdt), wf_ref[...], preferred_element_type=jnp.float32)
        o_ref[...] = o + bf_ref[...]


def bronet_forward(x, params, *, num_layers, tile_b=None,
                   compute_dtype=jnp.bfloat16, skip_ln_affine=False,
                   skip_zero_bias=False, stream_layers=None,
                   unroll_layers=None):
    """BroNet forward: projection -> num_layers residual blocks -> final linear.

    x: (B, input_size) f32.  params: dict from init_params (all f32).
    skip_ln_affine / skip_zero_bias are fast paths for the default init
    (gamma=1/beta=0 and zero Linear biases).  When params are concrete the
    wrapper verifies the claim; when traced under jit they are trusted.
    """
    assert num_layers >= 1, "num_layers must be >= 1"
    B, IN = x.shape
    H = params["wp"].shape[1]
    OUT = params["wf"].shape[1]
    L = num_layers

    # --- trusted-caller fast-path sanity checks (only on concrete params) -----
    def _all_equal(arrs, val):
        try:
            return all(bool(jnp.all(a == val)) for a in arrs)
        except Exception:            # traced under jit: trust the caller
            return True

    if skip_ln_affine:
        assert (_all_equal([params["gp"], params["g1"], params["g2"]], 1.0)
                and _all_equal([params["bep"], params["be1"], params["be2"]], 0.0)), \
            "skip_ln_affine=True but LayerNorm gamma/beta are not identity"
    if skip_zero_bias:
        assert _all_equal([params["bp"], params["b1"], params["b2"]], 0.0), \
            "skip_zero_bias=True but Linear biases are not all zero"

    # --- lane padding: IN / H / OUT to multiples of 128 ------------------------
    INp = _round_up(IN, 128)
    Hp = _round_up(H, 128)
    OUTp = _round_up(OUT, 128)
    wbytes = jnp.dtype(compute_dtype).itemsize

    def pad_last(a, n):
        if a.shape[-1] == n:
            return a
        return jnp.pad(a, [(0, 0)] * (a.ndim - 1) + [(0, n - a.shape[-1])])

    wp = pad_last(jnp.pad(params["wp"], ((0, INp - IN), (0, 0))), Hp).astype(compute_dtype)
    w1 = pad_last(jnp.pad(params["w1"], ((0, 0), (0, Hp - H), (0, 0))), Hp).astype(compute_dtype)
    w2 = pad_last(jnp.pad(params["w2"], ((0, 0), (0, Hp - H), (0, 0))), Hp).astype(compute_dtype)
    wf = pad_last(jnp.pad(params["wf"], ((0, Hp - H), (0, 0))), OUTp).astype(compute_dtype)
    bf = pad_last(params["bf"], OUTp)

    # packed LN/bias slabs (zero-padded lanes keep LN inputs exactly zero there)
    pp = pad_last(jnp.concatenate([params["bp"], params["gp"], params["bep"]], axis=0), Hp)
    lp = pad_last(jnp.concatenate([params["b1"], params["g1"], params["be1"],
                                   params["b2"], params["g2"], params["be2"]], axis=1), Hp)

    # --- per-generation VMEM budget / batch tile / layer streaming ------------
    vmem_cap = _vmem_capacity_bytes()
    budget = max(16 << 20, vmem_cap - (8 << 20))           # ~8 MiB headroom

    def footprint(tb, lps, wbufs):
        const_w = (INp * Hp + Hp * OUTp) * wbytes + (3 * Hp + OUTp) * 4
        step_w = wbufs * lps * (2 * Hp * Hp * wbytes + 6 * Hp * 4)
        io = 2 * tb * INp * wbytes + 2 * tb * OUTp * 4      # x / out, double-buffered
        act = 6 * tb * Hp * 4                               # h carry + working temporaries
        return const_w + step_w + io + act

    if tile_b is None:
        tile_b = min(512, _round_up(B, 8))
        # >= 2 batch grid steps for big batches so the "parallel" axis can
        # shard across the two v7x TensorCores (no effect on v5e/v6e).
        if B > 256 and -(-B // tile_b) < 2:
            tile_b = _round_up(-(-B // 2), 8)

    if stream_layers is None:
        # keep the fully-resident weight stack only if it fits the budget
        stream_layers = footprint(tile_b, L, 1) > 0.9 * budget
    layers_per_step = 1 if stream_layers else L
    n_layer_steps = L // layers_per_step
    w_bufs = 2 if stream_layers else 1

    # shrink the batch tile until the footprint fits the VMEM budget
    while tile_b > 8 and footprint(tile_b, layers_per_step, w_bufs) > budget:
        tile_b = max(8, _round_up(tile_b // 2, 8))

    Bp = _round_up(B, tile_b)
    n_batch_tiles = Bp // tile_b
    xk = jnp.pad(x, ((0, Bp - B), (0, INp - IN))).astype(compute_dtype)

    fp = footprint(tile_b, layers_per_step, w_bufs)
    vmem_limit = int(min(budget, max(32 << 20, 2 * fp)))

    if unroll_layers is None:
        unroll = layers_per_step <= 8
    else:
        unroll = bool(unroll_layers)

    # --- BlockSpecs ------------------------------------------------------------
    def const_spec(shape):
        n = len(shape)
        return pl.BlockSpec(shape, lambda i, s, n=n: (0,) * n,
                            pipeline_mode=pl.Buffered(1))

    if stream_layers:
        # one layer per grid step; default double-buffering overlaps the DMA
        # of layer l+1 with the compute of layer l
        w1_spec = pl.BlockSpec((1, Hp, Hp), lambda i, s: (s, 0, 0))
        w2_spec = pl.BlockSpec((1, Hp, Hp), lambda i, s: (s, 0, 0))
        lp_spec = pl.BlockSpec((1, 6, Hp), lambda i, s: (s, 0, 0))
    else:
        w1_spec = const_spec((L, Hp, Hp))
        w2_spec = const_spec((L, Hp, Hp))
        lp_spec = const_spec((L, 6, Hp))

    weight_elems = INp * Hp + 2 * L * Hp * Hp + Hp * OUTp
    layer_bytes = 2 * L * Hp * Hp * wbytes + 6 * L * Hp * 4
    other_param_bytes = (INp * Hp + Hp * OUTp) * wbytes + (3 * Hp + OUTp) * 4
    cost = pl.CostEstimate(
        flops=2 * Bp * weight_elems,
        transcendentals=Bp * (2 * L + 1),                   # one rsqrt per row per LN
        bytes_accessed=int(Bp * INp * wbytes
                           + other_param_bytes
                           + layer_bytes * (n_batch_tiles if stream_layers else 1)
                           + Bp * OUTp * 4),
    )

    kernel = functools.partial(
        _bronet_kernel, layers_per_step, n_layer_steps, unroll,
        not skip_ln_affine, not skip_zero_bias, 1.0 / H, compute_dtype)

    out = pl.pallas_call(
        kernel,
        out_shape=jax.ShapeDtypeStruct((Bp, OUTp), jnp.float32),
        grid_spec=pltpu.PrefetchScalarGridSpec(
            num_scalar_prefetch=0,
            grid=(n_batch_tiles, n_layer_steps),
            in_specs=[
                pl.BlockSpec((tile_b, INp), lambda i, s: (i, 0)),   # x
                const_spec((INp, Hp)),                              # wp
                const_spec((3, Hp)),                                # packed proj LN/bias
                w1_spec,                                            # w1 (stream or resident)
                w2_spec,                                            # w2
                lp_spec,                                            # packed per-layer LN/bias
                const_spec((Hp, OUTp)),                             # wf (lane-padded)
                const_spec((1, OUTp)),                              # bf (lane-padded)
            ],
            out_specs=pl.BlockSpec((tile_b, OUTp), lambda i, s: (i, 0)),
            scratch_shapes=[pltpu.VMEM((tile_b, Hp), jnp.float32)],  # residual carry h
        ),
        compiler_params=pltpu.CompilerParams(
            dimension_semantics=("parallel", "arbitrary"),
            vmem_limit_bytes=vmem_limit),
        cost_estimate=cost,
    )(xk, wp, pp, w1, w2, lp, wf, bf)

    return out[:B, :OUT]


def init_params(key, input_size, hidden_size, output_size, num_layers):
    """Deterministic init mirroring the torch module: orthogonal weights,
    zero Linear biases, LayerNorm gamma=1 / beta=0."""
    ortho = jax.nn.initializers.orthogonal()
    keys = jax.random.split(key, 2 + 2 * num_layers)
    H, L = hidden_size, num_layers

    p = {}
    p["wp"] = ortho(keys[0], (input_size, H), jnp.float32)
    p["bp"] = jnp.zeros((1, H), jnp.float32)
    p["gp"] = jnp.ones((1, H), jnp.float32)
    p["bep"] = jnp.zeros((1, H), jnp.float32)

    w1 = [ortho(keys[1 + 2 * i], (H, H), jnp.float32) for i in range(L)]
    w2 = [ortho(keys[2 + 2 * i], (H, H), jnp.float32) for i in range(L)]
    p["w1"] = jnp.stack(w1)                       # (L, H, H)
    p["w2"] = jnp.stack(w2)                       # (L, H, H)
    p["b1"] = jnp.zeros((L, 1, H), jnp.float32)
    p["b2"] = jnp.zeros((L, 1, H), jnp.float32)
    p["g1"] = jnp.ones((L, 1, H), jnp.float32)
    p["g2"] = jnp.ones((L, 1, H), jnp.float32)
    p["be1"] = jnp.zeros((L, 1, H), jnp.float32)
    p["be2"] = jnp.zeros((L, 1, H), jnp.float32)

    p["wf"] = ortho(keys[-1], (H, output_size), jnp.float32)
    p["bf"] = jnp.zeros((1, output_size), jnp.float32)
    return p


def bronet_reference(x, params, num_layers):
    """Pure-JAX reference of the torch forward pass, for verification."""
    def ln(h, g, b):
        mu = jnp.mean(h, axis=-1, keepdims=True)
        var = jnp.mean((h - mu) ** 2, axis=-1, keepdims=True)
        return (h - mu) / jnp.sqrt(var + LN_EPS) * g + b

    h = jnp.maximum(ln(x @ params["wp"] + params["bp"], params["gp"], params["bep"]), 0.0)
    for i in range(num_layers):
        y = jnp.maximum(ln(h @ params["w1"][i] + params["b1"][i],
                           params["g1"][i], params["be1"][i]), 0.0)
        y = ln(y @ params["w2"][i] + params["b2"][i],
               params["g2"][i], params["be2"][i])
        h = h + y
    return h @ params["wf"] + params["bf"]


if __name__ == "__main__":
    INPUT_SIZE = 32
    HIDDEN_SIZE = 32
    OUTPUT_SIZE = 16
    NUM_LAYERS = 2
    BATCH = 16

    key = jax.random.PRNGKey(0)
    k_x, k_p = jax.random.split(key)
    x = jax.random.normal(k_x, (BATCH, INPUT_SIZE), jnp.float32)
    params = init_params(k_p, INPUT_SIZE, HIDDEN_SIZE, OUTPUT_SIZE, NUM_LAYERS)
    ref = bronet_reference(x, params, NUM_LAYERS)

    # 1) f32 MXU path, auto (resident weights, unrolled layer loop)
    out_f32 = jax.block_until_ready(
        bronet_forward(x, params, num_layers=NUM_LAYERS,
                       compute_dtype=jnp.float32))
    assert out_f32.shape == (BATCH, OUTPUT_SIZE)
    assert jnp.allclose(out_f32, ref, atol=1e-4, rtol=1e-4), "f32 resident mismatch"

    # 2) forced layer-streaming grid axis + identity-affine / zero-bias fast paths
    out_stream = jax.block_until_ready(
        bronet_forward(x, params, num_layers=NUM_LAYERS,
                       compute_dtype=jnp.float32, stream_layers=True,
                       skip_ln_affine=True, skip_zero_bias=True))
    assert jnp.allclose(out_stream, ref, atol=1e-4, rtol=1e-4), "streaming mismatch"

    # 3) resident weights with the fori_loop(unroll=2) deep-model path
    out_fori = jax.block_until_ready(
        bronet_forward(x, params, num_layers=NUM_LAYERS,
                       compute_dtype=jnp.float32, unroll_layers=False))
    assert jnp.allclose(out_fori, ref, atol=1e-4, rtol=1e-4), "fori mismatch"

    # 4) default bf16-MXU / f32-accumulate path -- loose check vs f32 reference
    out_bf16 = jax.block_until_ready(
        bronet_forward(x, params, num_layers=NUM_LAYERS))
    rel_err = jnp.max(jnp.abs(out_bf16 - ref)) / (jnp.max(jnp.abs(ref)) + 1e-6)
    assert rel_err < 0.05, f"bf16 mismatch (rel_err={rel_err})"

    print("KERNEL_OK")
</pallas_src>

<mosaic_0001>
module attributes {stable_mosaic.version = 11 : i64} {
  func.func @_bronet_kernel(%arg0: i32, %arg1: i32, %arg2: memref<16x128xf32, #tpu.memory_space<vmem>>, %arg3: memref<128x128xf32, #tpu.memory_space<vmem>>, %arg4: memref<3x128xf32, #tpu.memory_space<vmem>>, %arg5: memref<2x128x128xf32, #tpu.memory_space<vmem>>, %arg6: memref<2x128x128xf32, #tpu.memory_space<vmem>>, %arg7: memref<2x6x128xf32, #tpu.memory_space<vmem>>, %arg8: memref<128x128xf32, #tpu.memory_space<vmem>>, %arg9: memref<1x128xf32, #tpu.memory_space<vmem>>, %arg10: memref<16x128xf32, #tpu.memory_space<vmem>>, %arg11: memref<16x128xf32, #tpu.memory_space<vmem>>) attributes {dimension_semantics = [#tpu.dimension_semantics<parallel>, #tpu.dimension_semantics<arbitrary>], iteration_bounds = array<i64: 1, 1>, scalar_prefetch = 0 : i64, scratch_operands = 1 : i64, tpu.core_type = #tpu.core_type<tc>, window_params = [{transform_indices = @transform_0, window_bounds = array<i64: 16, 128>}, {pipeline_mode = #tpu.pipeline_mode<synchronous>, transform_indices = @transform_1, window_bounds = array<i64: 128, 128>}, {pipeline_mode = #tpu.pipeline_mode<synchronous>, transform_indices = @transform_2, window_bounds = array<i64: 3, 128>}, {pipeline_mode = #tpu.pipeline_mode<synchronous>, transform_indices = @transform_3, window_bounds = array<i64: 2, 128, 128>}, {pipeline_mode = #tpu.pipeline_mode<synchronous>, transform_indices = @transform_4, window_bounds = array<i64: 2, 128, 128>}, {pipeline_mode = #tpu.pipeline_mode<synchronous>, transform_indices = @transform_5, window_bounds = array<i64: 2, 6, 128>}, {pipeline_mode = #tpu.pipeline_mode<synchronous>, transform_indices = @transform_6, window_bounds = array<i64: 128, 128>}, {pipeline_mode = #tpu.pipeline_mode<synchronous>, transform_indices = @transform_7, window_bounds = array<i64: 1, 128>}, {transform_indices = @transform_8, window_bounds = array<i64: 16, 128>}]} {
    %c0_i32 = arith.constant 0 : i32
    %0 = arith.cmpi eq, %arg1, %c0_i32 : i32
    %1 = arith.extui %0 : i1 to i32
    %c0_i32_0 = arith.constant 0 : i32
    %2 = arith.cmpi ne, %1, %c0_i32_0 : i32
    scf.if %2 {
      %c0_52 = arith.constant 0 : index
      %c0_53 = arith.constant 0 : index
      %146 = vector.load %arg4[%c0_52, %c0_53] : memref<3x128xf32, #tpu.memory_space<vmem>>, vector<3x128xf32>
      %c0_54 = arith.constant 0 : index
      %c0_55 = arith.constant 0 : index
      %147 = vector.load %arg2[%c0_54, %c0_55] : memref<16x128xf32, #tpu.memory_space<vmem>>, vector<16x128xf32>
      %c0_56 = arith.constant 0 : index
      %c0_57 = arith.constant 0 : index
      %148 = vector.load %arg3[%c0_56, %c0_57] : memref<128x128xf32, #tpu.memory_space<vmem>>, vector<128x128xf32>
      %cst_58 = arith.constant dense<0.000000e+00> : vector<16x128xf32>
      %149 = tpu.matmul %147, %148, %cst_58 {dimension_numbers = #tpu.dot_dimension_numbers<[1], [0], [0], [1], [0, 0, 1, 1], [], []>} : vector<16x128xf32>, vector<128x128xf32>, vector<16x128xf32> -> vector<16x128xf32>
      %150 = vector.extract_strided_slice %146 {offsets = [0, 0], sizes = [1, 128], strides = [1, 1]} : vector<3x128xf32> to vector<1x128xf32>
      %151 = vector.broadcast %150 : vector<1x128xf32> to vector<16x128xf32>
      %152 = arith.addf %149, %151 : vector<16x128xf32>
      %153 = vector.extract_strided_slice %146 {offsets = [1, 0], sizes = [1, 128], strides = [1, 1]} : vector<3x128xf32> to vector<1x128xf32>
      %154 = vector.extract_strided_slice %146 {offsets = [2, 0], sizes = [1, 128], strides = [1, 1]} : vector<3x128xf32> to vector<1x128xf32>
      %cst_59 = arith.constant dense<0.000000e+00> : vector<16xf32>
      %155 = vector.multi_reduction <add>, %152, %cst_59 [1] : vector<16x128xf32> to vector<16xf32>
      %156 = vector.shape_cast %155 : vector<16xf32> to vector<16x1xf32>
      %157 = arith.mulf %152, %152 : vector<16x128xf32>
      %cst_60 = arith.constant dense<0.000000e+00> : vector<16xf32>
      %158 = vector.multi_reduction <add>, %157, %cst_60 [1] : vector<16x128xf32> to vector<16xf32>
      %159 = vector.shape_cast %158 : vector<16xf32> to vector<16x1xf32>
      %cst_61 = arith.constant 3.125000e-02 : f32
      %160 = vector.broadcast %cst_61 : f32 to vector<16x1xf32>
      %161 = arith.mulf %156, %160 : vector<16x1xf32>
      %cst_62 = arith.constant 3.125000e-02 : f32
      %162 = vector.broadcast %cst_62 : f32 to vector<16x1xf32>
      %163 = arith.mulf %159, %162 : vector<16x1xf32>
      %164 = arith.mulf %161, %161 : vector<16x1xf32>
      %165 = arith.subf %163, %164 : vector<16x1xf32>
      %cst_63 = arith.constant 0.000000e+00 : f32
      %166 = vector.broadcast %cst_63 : f32 to vector<16x1xf32>
      %167 = arith.maximumf %165, %166 : vector<16x1xf32>
      %168 = vector.broadcast %161 : vector<16x1xf32> to vector<16x128xf32>
      %169 = arith.subf %152, %168 : vector<16x128xf32>
      %cst_64 = arith.constant 9.99999974E-6 : f32
      %170 = vector.broadcast %cst_64 : f32 to vector<16x1xf32>
      %171 = arith.addf %167, %170 : vector<16x1xf32>
      %172 = math.rsqrt %171 : vector<16x1xf32>
      %173 = vector.broadcast %172 : vector<16x1xf32> to vector<16x128xf32>
      %174 = arith.mulf %169, %173 : vector<16x128xf32>
      %175 = vector.broadcast %153 : vector<1x128xf32> to vector<16x128xf32>
      %176 = arith.mulf %174, %175 : vector<16x128xf32>
      %177 = vector.broadcast %154 : vector<1x128xf32> to vector<16x128xf32>
      %178 = arith.addf %176, %177 : vector<16x128xf32>
      %cst_65 = arith.constant 0.000000e+00 : f32
      %179 = vector.broadcast %cst_65 : f32 to vector<16x128xf32>
      %180 = arith.maximumf %178, %179 : vector<16x128xf32>
      %c0_66 = arith.constant 0 : index
      %c0_67 = arith.constant 0 : index
      %181 = vector.load %arg11[%c0_66, %c0_67] : memref<16x128xf32, #tpu.memory_space<vmem>>, vector<16x128xf32>
      tpu.vector_store %arg11[%c0_66, %c0_67], %180 {strides = array<i32>} : memref<16x128xf32, #tpu.memory_space<vmem>>, vector<16x128xf32>,
    } else {
    }
    %c0 = arith.constant 0 : index
    %c0_1 = arith.constant 0 : index
    %3 = vector.load %arg11[%c0, %c0_1] : memref<16x128xf32, #tpu.memory_space<vmem>>, vector<16x128xf32>
    %c0_2 = arith.constant 0 : index
    %c0_3 = arith.constant 0 : index
    %c0_4 = arith.constant 0 : index
    %4 = vector.load %arg5[%c0_2, %c0_3, %c0_4] : memref<2x128x128xf32, #tpu.memory_space<vmem>>, vector<1x128x128xf32>
    %5 = vector.shape_cast %4 : vector<1x128x128xf32> to vector<128x128xf32>
    %c0_5 = arith.constant 0 : index
    %c0_6 = arith.constant 0 : index
    %c0_7 = arith.constant 0 : index
    %6 = vector.load %arg6[%c0_5, %c0_6, %c0_7] : memref<2x128x128xf32, #tpu.memory_space<vmem>>, vector<1x128x128xf32>
    %7 = vector.shape_cast %6 : vector<1x128x128xf32> to vector<128x128xf32>
    %c0_8 = arith.constant 0 : index
    %c0_9 = arith.constant 0 : index
    %c0_10 = arith.constant 0 : index
    %8 = vector.load %arg7[%c0_8, %c0_9, %c0_10] : memref<2x6x128xf32, #tpu.memory_space<vmem>>, vector<1x6x128xf32>
    %9 = vector.shape_cast %8 : vector<1x6x128xf32> to vector<6x128xf32>
    %cst = arith.constant dense<0.000000e+00> : vector<16x128xf32>
    %10 = tpu.matmul %3, %5, %cst {dimension_numbers = #tpu.dot_dimension_numbers<[1], [0], [0], [1], [0, 0, 1, 1], [], []>} : vector<16x128xf32>, vector<128x128xf32>, vector<16x128xf32> -> vector<16x128xf32>
    %11 = vector.extract_strided_slice %9 {offsets = [0, 0], sizes = [1, 128], strides = [1, 1]} : vector<6x128xf32> to vector<1x128xf32>
    %12 = vector.broadcast %11 : vector<1x128xf32> to vector<16x128xf32>
    %13 = arith.addf %10, %12 : vector<16x128xf32>
    %14 = vector.extract_strided_slice %9 {offsets = [1, 0], sizes = [1, 128], strides = [1, 1]} : vector<6x128xf32> to vector<1x128xf32>
    %15 = vector.extract_strided_slice %9 {offsets = [2, 0], sizes = [1, 128], strides = [1, 1]} : vector<6x128xf32> to vector<1x128xf32>
    %cst_11 = arith.constant dense<0.000000e+00> : vector<16xf32>
    %16 = vector.multi_reduction <add>, %13, %cst_11 [1] : vector<16x128xf32> to vector<16xf32>
    %17 = vector.shape_cast %16 : vector<16xf32> to vector<16x1xf32>
    %18 = arith.mulf %13, %13 : vector<16x128xf32>
    %cst_12 = arith.constant dense<0.000000e+00> : vector<16xf32>
    %19 = vector.multi_reduction <add>, %18, %cst_12 [1] : vector<16x128xf32> to vector<16xf32>
    %20 = vector.shape_cast %19 : vector<16xf32> to vector<16x1xf32>
    %cst_13 = arith.constant 3.125000e-02 : f32
    %21 = vector.broadcast %cst_13 : f32 to vector<16x1xf32>
    %22 = arith.mulf %17, %21 : vector<16x1xf32>
    %cst_14 = arith.constant 3.125000e-02 : f32
    %23 = vector.broadcast %cst_14 : f32 to vector<16x1xf32>
    %24 = arith.mulf %20, %23 : vector<16x1xf32>
    %25 = arith.mulf %22, %22 : vector<16x1xf32>
    %26 = arith.subf %24, %25 : vector<16x1xf32>
    %cst_15 = arith.constant 0.000000e+00 : f32
    %27 = vector.broadcast %cst_15 : f32 to vector<16x1xf32>
    %28 = arith.maximumf %26, %27 : vector<16x1xf32>
    %29 = vector.broadcast %22 : vector<16x1xf32> to vector<16x128xf32>
    %30 = arith.subf %13, %29 : vector<16x128xf32>
    %cst_16 = arith.constant 9.99999974E-6 : f32
    %31 = vector.broadcast %cst_16 : f32 to vector<16x1xf32>
    %32 = arith.addf %28, %31 : vector<16x1xf32>
    %33 = math.rsqrt %32 : vector<16x1xf32>
    %34 = vector.broadcast %33 : vector<16x1xf32> to vector<16x128xf32>
    %35 = arith.mulf %30, %34 : vector<16x128xf32>
    %36 = vector.broadcast %14 : vector<1x128xf32> to vector<16x128xf32>
    %37 = arith.mulf %35, %36 : vector<16x128xf32>
    %38 = vector.broadcast %15 : vector<1x128xf32> to vector<16x128xf32>
    %39 = arith.addf %37, %38 : vector<16x128xf32>
    %cst_17 = arith.constant 0.000000e+00 : f32
    %40 = vector.broadcast %cst_17 : f32 to vector<16x128xf32>
    %41 = arith.maximumf %39, %40 : vector<16x128xf32>
    %cst_18 = arith.constant dense<0.000000e+00> : vector<16x128xf32>
    %42 = tpu.matmul %41, %7, %cst_18 {dimension_numbers = #tpu.dot_dimension_numbers<[1], [0], [0], [1], [0, 0, 1, 1], [], []>} : vector<16x128xf32>, vector<128x128xf32>, vector<16x128xf32> -> vector<16x128xf32>
    %43 = vector.extract_strided_slice %9 {offsets = [3, 0], sizes = [1, 128], strides = [1, 1]} : vector<6x128xf32> to vector<1x128xf32>
    %44 = vector.broadcast %43 : vector<1x128xf32> to vector<16x128xf32>
    %45 = arith.addf %42, %44 : vector<16x128xf32>
    %46 = vector.extract_strided_slice %9 {offsets = [4, 0], sizes = [1, 128], strides = [1, 1]} : vector<6x128xf32> to vector<1x128xf32>
    %47 = vector.extract_strided_slice %9 {offsets = [5, 0], sizes = [1, 128], strides = [1, 1]} : vector<6x128xf32> to vector<1x128xf32>
    %cst_19 = arith.constant dense<0.000000e+00> : vector<16xf32>
    %48 = vector.multi_reduction <add>, %45, %cst_19 [1] : vector<16x128xf32> to vector<16xf32>
    %49 = vector.shape_cast %48 : vector<16xf32> to vector<16x1xf32>
    %50 = arith.mulf %45, %45 : vector<16x128xf32>
    %cst_20 = arith.constant dense<0.000000e+00> : vector<16xf32>
    %51 = vector.multi_reduction <add>, %50, %cst_20 [1] : vector<16x128xf32> to vector<16xf32>
    %52 = vector.shape_cast %51 : vector<16xf32> to vector<16x1xf32>
    %cst_21 = arith.constant 3.125000e-02 : f32
    %53 = vector.broadcast %cst_21 : f32 to vector<16x1xf32>
    %54 = arith.mulf %49, %53 : vector<16x1xf32>
    %cst_22 = arith.constant 3.125000e-02 : f32
    %55 = vector.broadcast %cst_22 : f32 to vector<16x1xf32>
    %56 = arith.mulf %52, %55 : vector<16x1xf32>
    %57 = arith.mulf %54, %54 : vector<16x1xf32>
    %58 = arith.subf %56, %57 : vector<16x1xf32>
    %cst_23 = arith.constant 0.000000e+00 : f32
    %59 = vector.broadcast %cst_23 : f32 to vector<16x1xf32>
    %60 = arith.maximumf %58, %59 : vector<16x1xf32>
    %61 = vector.broadcast %54 : vector<16x1xf32> to vector<16x128xf32>
    %62 = arith.subf %45, %61 : vector<16x128xf32>
    %cst_24 = arith.constant 9.99999974E-6 : f32
    %63 = vector.broadcast %cst_24 : f32 to vector<16x1xf32>
    %64 = arith.addf %60, %63 : vector<16x1xf32>
    %65 = math.rsqrt %64 : vector<16x1xf32>
    %66 = vector.broadcast %65 : vector<16x1xf32> to vector<16x128xf32>
    %67 = arith.mulf %62, %66 : vector<16x128xf32>
    %68 = vector.broadcast %46 : vector<1x128xf32> to vector<16x128xf32>
    %69 = arith.mulf %67, %68 : vector<16x128xf32>
    %70 = vector.broadcast %47 : vector<1x128xf32> to vector<16x128xf32>
    %71 = arith.addf %69, %70 : vector<16x128xf32>
    %72 = arith.addf %3, %71 : vector<16x128xf32>
    %c1 = arith.constant 1 : index
    %c0_25 = arith.constant 0 : index
    %c0_26 = arith.constant 0 : index
    %73 = vector.load %arg5[%c1, %c0_25, %c0_26] : memref<2x128x128xf32, #tpu.memory_space<vmem>>, vector<1x128x128xf32>
    %74 = vector.shape_cast %73 : vector<1x128x128xf32> to vector<128x128xf32>
    %c1_27 = arith.constant 1 : index
    %c0_28 = arith.constant 0 : index
    %c0_29 = arith.constant 0 : index
    %75 = vector.load %arg6[%c1_27, %c0_28, %c0_29] : memref<2x128x128xf32, #tpu.memory_space<vmem>>, vector<1x128x128xf32>
    %76 = vector.shape_cast %75 : vector<1x128x128xf32> to vector<128x128xf32>
    %c1_30 = arith.constant 1 : index
    %c0_31 = arith.constant 0 : index
    %c0_32 = arith.constant 0 : index
    %77 = vector.load %arg7[%c1_30, %c0_31, %c0_32] : memref<2x6x128xf32, #tpu.memory_space<vmem>>, vector<1x6x128xf32>
    %78 = vector.shape_cast %77 : vector<1x6x128xf32> to vector<6x128xf32>
    %cst_33 = arith.constant dense<0.000000e+00> : vector<16x128xf32>
    %79 = tpu.matmul %72, %74, %cst_33 {dimension_numbers = #tpu.dot_dimension_numbers<[1], [0], [0], [1], [0, 0, 1, 1], [], []>} : vector<16x128xf32>, vector<128x128xf32>, vector<16x128xf32> -> vector<16x128xf32>
    %80 = vector.extract_strided_slice %78 {offsets = [0, 0], sizes = [1, 128], strides = [1, 1]} : vector<6x128xf32> to vector<1x128xf32>
    %81 = vector.broadcast %80 : vector<1x128xf32> to vector<16x128xf32>
    %82 = arith.addf %79, %81 : vector<16x128xf32>
    %83 = vector.extract_strided_slice %78 {offsets = [1, 0], sizes = [1, 128], strides = [1, 1]} : vector<6x128xf32> to vector<1x128xf32>
    %84 = vector.extract_strided_slice %78 {offsets = [2, 0], sizes = [1, 128], strides = [1, 1]} : vector<6x128xf32> to vector<1x128xf32>
    %cst_34 = arith.constant dense<0.000000e+00> : vector<16xf32>
    %85 = vector.multi_reduction <add>, %82, %cst_34 [1] : vector<16x128xf32> to vector<16xf32>
    %86 = vector.shape_cast %85 : vector<16xf32> to vector<16x1xf32>
    %87 = arith.mulf %82, %82 : vector<16x128xf32>
    %cst_35 = arith.constant dense<0.000000e+00> : vector<16xf32>
    %88 = vector.multi_reduction <add>, %87, %cst_35 [1] : vector<16x128xf32> to vector<16xf32>
    %89 = vector.shape_cast %88 : vector<16xf32> to vector<16x1xf32>
    %cst_36 = arith.constant 3.125000e-02 : f32
    %90 = vector.broadcast %cst_36 : f32 to vector<16x1xf32>
    %91 = arith.mulf %86, %90 : vector<16x1xf32>
    %cst_37 = arith.constant 3.125000e-02 : f32
    %92 = vector.broadcast %cst_37 : f32 to vector<16x1xf32>
    %93 = arith.mulf %89, %92 : vector<16x1xf32>
    %94 = arith.mulf %91, %91 : vector<16x1xf32>
    %95 = arith.subf %93, %94 : vector<16x1xf32>
    %cst_38 = arith.constant 0.000000e+00 : f32
    %96 = vector.broadcast %cst_38 : f32 to vector<16x1xf32>
    %97 = arith.maximumf %95, %96 : vector<16x1xf32>
    %98 = vector.broadcast %91 : vector<16x1xf32> to vector<16x128xf32>
    %99 = arith.subf %82, %98 : vector<16x128xf32>
    %cst_39 = arith.constant 9.99999974E-6 : f32
    %100 = vector.broadcast %cst_39 : f32 to vector<16x1xf32>
    %101 = arith.addf %97, %100 : vector<16x1xf32>
    %102 = math.rsqrt %101 : vector<16x1xf32>
    %103 = vector.broadcast %102 : vector<16x1xf32> to vector<16x128xf32>
    %104 = arith.mulf %99, %103 : vector<16x128xf32>
    %105 = vector.broadcast %83 : vector<1x128xf32> to vector<16x128xf32>
    %106 = arith.mulf %104, %105 : vector<16x128xf32>
    %107 = vector.broadcast %84 : vector<1x128xf32> to vector<16x128xf32>
    %108 = arith.addf %106, %107 : vector<16x128xf32>
    %cst_40 = arith.constant 0.000000e+00 : f32
    %109 = vector.broadcast %cst_40 : f32 to vector<16x128xf32>
    %110 = arith.maximumf %108, %109 : vector<16x128xf32>
    %cst_41 = arith.constant dense<0.000000e+00> : vector<16x128xf32>
    %111 = tpu.matmul %110, %76, %cst_41 {dimension_numbers = #tpu.dot_dimension_numbers<[1], [0], [0], [1], [0, 0, 1, 1], [], []>} : vector<16x128xf32>, vector<128x128xf32>, vector<16x128xf32> -> vector<16x128xf32>
    %112 = vector.extract_strided_slice %78 {offsets = [3, 0], sizes = [1, 128], strides = [1, 1]} : vector<6x128xf32> to vector<1x128xf32>
    %113 = vector.broadcast %112 : vector<1x128xf32> to vector<16x128xf32>
    %114 = arith.addf %111, %113 : vector<16x128xf32>
    %115 = vector.extract_strided_slice %78 {offsets = [4, 0], sizes = [1, 128], strides = [1, 1]} : vector<6x128xf32> to vector<1x128xf32>
    %116 = vector.extract_strided_slice %78 {offsets = [5, 0], sizes = [1, 128], strides = [1, 1]} : vector<6x128xf32> to vector<1x128xf32>
    %cst_42 = arith.constant dense<0.000000e+00> : vector<16xf32>
    %117 = vector.multi_reduction <add>, %114, %cst_42 [1] : vector<16x128xf32> to vector<16xf32>
    %118 = vector.shape_cast %117 : vector<16xf32> to vector<16x1xf32>
    %119 = arith.mulf %114, %114 : vector<16x128xf32>
    %cst_43 = arith.constant dense<0.000000e+00> : vector<16xf32>
    %120 = vector.multi_reduction <add>, %119, %cst_43 [1] : vector<16x128xf32> to vector<16xf32>
    %121 = vector.shape_cast %120 : vector<16xf32> to vector<16x1xf32>
    %cst_44 = arith.constant 3.125000e-02 : f32
    %122 = vector.broadcast %cst_44 : f32 to vector<16x1xf32>
    %123 = arith.mulf %118, %122 : vector<16x1xf32>
    %cst_45 = arith.constant 3.125000e-02 : f32
    %124 = vector.broadcast %cst_45 : f32 to vector<16x1xf32>
    %125 = arith.mulf %121, %124 : vector<16x1xf32>
    %126 = arith.mulf %123, %123 : vector<16x1xf32>
    %127 = arith.subf %125, %126 : vector<16x1xf32>
    %cst_46 = arith.constant 0.000000e+00 : f32
    %128 = vector.broadcast %cst_46 : f32 to vector<16x1xf32>
    %129 = arith.maximumf %127, %128 : vector<16x1xf32>
    %130 = vector.broadcast %123 : vector<16x1xf32> to vector<16x128xf32>
    %131 = arith.subf %114, %130 : vector<16x128xf32>
    %cst_47 = arith.constant 9.99999974E-6 : f32
    %132 = vector.broadcast %cst_47 : f32 to vector<16x1xf32>
    %133 = arith.addf %129, %132 : vector<16x1xf32>
    %134 = math.rsqrt %133 : vector<16x1xf32>
    %135 = vector.broadcast %134 : vector<16x1xf32> to vector<16x128xf32>
    %136 = arith.mulf %131, %135 : vector<16x128xf32>
    %137 = vector.broadcast %115 : vector<1x128xf32> to vector<16x128xf32>
    %138 = arith.mulf %136, %137 : vector<16x128xf32>
    %139 = vector.broadcast %116 : vector<1x128xf32> to vector<16x128xf32>
    %140 = arith.addf %138, %139 : vector<16x128xf32>
    %141 = arith.addf %72, %140 : vector<16x128xf32>
    %c0_48 = arith.constant 0 : index
    %c0_49 = arith.constant 0 : index
    %142 = vector.load %arg11[%c0_48, %c0_49] : memref<16x128xf32, #tpu.memory_space<vmem>>, vector<16x128xf32>
    tpu.vector_store %arg11[%c0_48, %c0_49], %141 {strides = array<i32>} : memref<16x128xf32, #tpu.memory_space<vmem>>, vector<16x128xf32>,
    %c0_i32_50 = arith.constant 0 : i32
    %143 = arith.cmpi eq, %arg1, %c0_i32_50 : i32
    %144 = arith.extui %143 : i1 to i32
    %c0_i32_51 = arith.constant 0 : i32
    %145 = arith.cmpi ne, %144, %c0_i32_51 : i32
    scf.if %145 {
      %c0_52 = arith.constant 0 : index
      %c0_53 = arith.constant 0 : index
      %146 = vector.load %arg8[%c0_52, %c0_53] : memref<128x128xf32, #tpu.memory_space<vmem>>, vector<128x128xf32>
      %cst_54 = arith.constant dense<0.000000e+00> : vector<16x128xf32>
      %147 = tpu.matmul %141, %146, %cst_54 {dimension_numbers = #tpu.dot_dimension_numbers<[1], [0], [0], [1], [0, 0, 1, 1], [], []>} : vector<16x128xf32>, vector<128x128xf32>, vector<16x128xf32> -> vector<16x128xf32>
      %c0_55 = arith.constant 0 : index
      %c0_56 = arith.constant 0 : index
      %148 = vector.load %arg9[%c0_55, %c0_56] : memref<1x128xf32, #tpu.memory_space<vmem>>, vector<1x128xf32>
      %149 = vector.broadcast %148 : vector<1x128xf32> to vector<16x128xf32>
      %150 = arith.addf %147, %149 : vector<16x128xf32>
      %c0_57 = arith.constant 0 : index
      %c0_58 = arith.constant 0 : index
      %151 = vector.load %arg10[%c0_57, %c0_58] : memref<16x128xf32, #tpu.memory_space<vmem>>, vector<16x128xf32>
      tpu.vector_store %arg10[%c0_57, %c0_58], %150 {strides = array<i32>} : memref<16x128xf32, #tpu.memory_space<vmem>>, vector<16x128xf32>,
    } else {
    }
    return
  }
  func.func @transform_0(%arg0: i32, %arg1: i32) -> (i32, i32) {
    %c0_i32 = arith.constant 0 : i32
    %c0_i32_0 = arith.constant 0 : i32
    return %arg0, %c0_i32 : i32, i32
  }
  func.func @transform_1(%arg0: i32, %arg1: i32) -> (i32, i32) {
    %c0_i32 = arith.constant 0 : i32
    %c0_i32_0 = arith.constant 0 : i32
    %c0_i32_1 = arith.constant 0 : i32
    return %c0_i32, %c0_i32_0 : i32, i32
  }
  func.func @transform_2(%arg0: i32, %arg1: i32) -> (i32, i32) {
    %c0_i32 = arith.constant 0 : i32
    %c0_i32_0 = arith.constant 0 : i32
    %c0_i32_1 = arith.constant 0 : i32
    return %c0_i32, %c0_i32_0 : i32, i32
  }
  func.func @transform_3(%arg0: i32, %arg1: i32) -> (i32, i32, i32) {
    %c0_i32 = arith.constant 0 : i32
    %c0_i32_0 = arith.constant 0 : i32
    %c0_i32_1 = arith.constant 0 : i32
    %c0_i32_2 = arith.constant 0 : i32
    return %c0_i32, %c0_i32_0, %c0_i32_1 : i32, i32, i32
  }
  func.func @transform_4(%arg0: i32, %arg1: i32) -> (i32, i32, i32) {
    %c0_i32 = arith.constant 0 : i32
    %c0_i32_0 = arith.constant 0 : i32
    %c0_i32_1 = arith.constant 0 : i32
    %c0_i32_2 = arith.constant 0 : i32
    return %c0_i32, %c0_i32_0, %c0_i32_1 : i32, i32, i32
  }
  func.func @transform_5(%arg0: i32, %arg1: i32) -> (i32, i32, i32) {
    %c0_i32 = arith.constant 0 : i32
    %c0_i32_0 = arith.constant 0 : i32
    %c0_i32_1 = arith.constant 0 : i32
    %c0_i32_2 = arith.constant 0 : i32
    return %c0_i32, %c0_i32_0, %c0_i32_1 : i32, i32, i32
  }
  func.func @transform_6(%arg0: i32, %arg1: i32) -> (i32, i32) {
    %c0_i32 = arith.constant 0 : i32
    %c0_i32_0 = arith.constant 0 : i32
    %c0_i32_1 = arith.constant 0 : i32
    return %c0_i32, %c0_i32_0 : i32, i32
  }
  func.func @transform_7(%arg0: i32, %arg1: i32) -> (i32, i32) {
    %c0_i32 = arith.constant 0 : i32
    %c0_i32_0 = arith.constant 0 : i32
    %c0_i32_1 = arith.constant 0 : i32
    return %c0_i32, %c0_i32_0 : i32, i32
  }
  func.func @transform_8(%arg0: i32, %arg1: i32) -> (i32, i32) {
    %c0_i32 = arith.constant 0 : i32
    %c0_i32_0 = arith.constant 0 : i32
    return %arg0, %c0_i32 : i32, i32
  }
}

</mosaic_0001>

<bundles_post_ra>
// kernel: tpu_custom_call.1
= control target key start
LH: loop header
LB: loop body
LE: loop exit
PB: predicated region body
PF: predicated region fallthrough
CT: control target
= control target key end

     0   :  { %13 = vsyncpa [#allocation4], 0  ;;  %s1864_s0 = inlined_call_operand.vmem [shape: f32[16,128], index: 0, kind: input, shape index: {}]   ;;  %s1865_s1 = inlined_call_operand.hbm [shape: f32[128,128], index: 1, kind: input, shape index: {}]   ;;  %s1866_s2 = inlined_call_operand.vmem [shape: f32[3,128], index: 2, kind: input, shape index: {}]   ;;  %s1867_s3 = inlined_call_operand.hbm [shape: f32[2,128,128], index: 3, kind: input, shape index: {}]   ;;  %s1868_s4 = inlined_call_operand.hbm [shape: f32[2,128,128], index: 4, kind: input, shape index: {}]   ;;  %s1869_s5 = inlined_call_operand.vmem [shape: f32[2,6,128], index: 5, kind: input, shape index: {}]   ;;  %s1870_s6 = inlined_call_operand.hbm [shape: f32[128,128], index: 6, kind: input, shape index: {}]   ;;  %s1871_s7 = inlined_call_operand.vmem [shape: f32[1,128], index: 7, kind: input, shape index: {}]   ;;  %s1872_s8 = inlined_call_operand.hbm [shape: f32[16,128], index: 8, kind: output, shape index: {}]  }
   0x1   :  { %14 = vsyncpa [#allocation7], 0 }
   0x2   :  { %15 = vsyncpa [#allocation10], 0 }
   0x3   :  { %16 = vsyncpa [#allocation5], 0  ;;  %s1567_s27 = smov [#allocation6]   ;;  %s1568_s29 = smov [#allocation3]  }
   0x4   :  { %s38_s28 = sshll.u32 %s1567_s27, 4  ;;  %s24_s30 = sshll.u32 %s1568_s29, 4  ;;  %s39_s28 = int_to_ptr.vmem [resolvable:$true] %s38_s28  ;;  %s1619_s30 = int_to_ptr.vmem [resolvable:$true] %s24_s30 }
   0x5   :  { %s1449_s11 = scalar_lea.hbm %s1867_s3, 4096 }
   0x6   :  { %p1450_p0 = scmp.ne.s32.totalorder %s1867_s3, %s1449_s11  ;;  %p1453_p1 = scmp.lt.u32.totalorder %s1449_s11, %s1867_s3 }
   0x8   :  { %p1455_p2 = pnand %p1453_p1, %p1450_p0 }
   0xa   :  { %1458 = shalt.err (!%p1455_p2)
}
   0xb   :  { %s1459_s16 = scalar_lea.vmem %s39_s28, 4096  ;;  %p1464_p4 = scmp.lt.s32.totalorder %s39_s28, %s39_s28 }
   0xc   :  { %p1460_p3 = scmp.ne.s32.totalorder %s39_s28, %s1459_s16  ;;  %p1465_p5 = scmp.lt.s32.totalorder %s1459_s16, %s1459_s16 }
   0xe   :  { %p1466_p6 = por %p1465_p5, %p1464_p4 }
  0x10   :  { %p1467_p7 = pnand %p1466_p6, %p1460_p3 }
  0x12   :  { %1470 = shalt.err (!%p1467_p7)
}
  0x13   :  { %s1569_s17 = smov 128   ;;  %s1570_s18 = smov 8  }
  0x14   :  { %44 = dma.hbm_to_vmem [thread:$0]  %s1867_s3, 4096, %s39_s28, [#allocation7], %s1569_s17, %s1569_s17, %s1570_s18  }
  0x15   :  { %s1471_s23 = scalar_lea.hbm %s1865_s1, 2048 }
  0x16   :  { %p1472_p8 = scmp.ne.s32.totalorder %s1865_s1, %s1471_s23  ;;  %p1475_p9 = scmp.lt.u32.totalorder %s1471_s23, %s1865_s1 }
  0x18   :  { %p1477_p10 = pnand %p1475_p9, %p1472_p8 }
  0x1a   :  { %1480 = shalt.err (!%p1477_p10)
}
  0x1b   :  { %s1481_s29 = scalar_lea.vmem %s1619_s30, 2048  ;;  %p1486_p12 = scmp.lt.s32.totalorder %s1619_s30, %s1619_s30 }
  0x1c   :  { %p1482_p11 = scmp.ne.s32.totalorder %s1619_s30, %s1481_s29  ;;  %p1487_p13 = scmp.lt.s32.totalorder %s1481_s29, %s1481_s29 }
  0x1e   :  { %p1488_p0 = por %p1487_p13, %p1486_p12 }
  0x20   :  { %p1489_p1 = pnand %p1488_p0, %p1482_p11 }
  0x22   :  { %1492 = shalt.err (!%p1489_p1)
}
  0x23   :  { %30 = dma.hbm_to_vmem [thread:$0]  %s1865_s1, 2048, %s1619_s30, [#allocation4], %s1569_s17, %s1569_s17, %s1570_s18  }
  0x24   :  { %s1571_s9 = smov [#allocation8]   ;;  %s1572_s11 = smov [#allocation9]  }
  0x25   :  { %s50_s10 = sshll.u32 %s1571_s9, 4  ;;  %s64_s12 = sshll.u32 %s1572_s11, 4  ;;  %s51_s10 = int_to_ptr.vmem [resolvable:$true] %s50_s10  ;;  %s1656_s12 = int_to_ptr.vmem [resolvable:$true] %s64_s12 }
  0x26   :  { %s1493_s15 = scalar_lea.hbm %s1868_s4, 4096 }
  0x27   :  { %p1494_p2 = scmp.ne.s32.totalorder %s1868_s4, %s1493_s15  ;;  %p1497_p3 = scmp.lt.u32.totalorder %s1493_s15, %s1868_s4 }
  0x29   :  { %p1499_p4 = pnand %p1497_p3, %p1494_p2 }
  0x2b   :  { %1502 = shalt.err (!%p1499_p4)
}
  0x2c   :  { %s1503_s1 = scalar_lea.vmem %s51_s10, 4096  ;;  %p1508_p6 = scmp.lt.s32.totalorder %s51_s10, %s51_s10 }
  0x2d   :  { %p1504_p5 = scmp.ne.s32.totalorder %s51_s10, %s1503_s1  ;;  %p1509_p7 = scmp.lt.s32.totalorder %s1503_s1, %s1503_s1 }
  0x2f   :  { %p1510_p8 = por %p1509_p7, %p1508_p6 }
  0x31   :  { %p1511_p9 = pnand %p1510_p8, %p1504_p5 }
  0x33   :  { %1514 = shalt.err (!%p1511_p9)
}
  0x34   :  { %56 = dma.hbm_to_vmem [thread:$0]  %s1868_s4, 4096, %s51_s10, [#allocation7], %s1569_s17, %s1569_s17, %s1570_s18  }
  0x35   :  { %s1515_s25 = scalar_lea.hbm %s1870_s6, 2048 }
  0x36   :  { %p1516_p10 = scmp.ne.s32.totalorder %s1870_s6, %s1515_s25  ;;  %p1519_p11 = scmp.lt.u32.totalorder %s1515_s25, %s1870_s6 }
  0x38   :  { %p1521_p12 = pnand %p1519_p11, %p1516_p10 }
  0x3a   :  { %1524 = shalt.err (!%p1521_p12)
}
  0x3b   :  { %s1525_s28 = scalar_lea.vmem %s1656_s12, 2048  ;;  %p1530_p0 = scmp.lt.s32.totalorder %s1656_s12, %s1656_s12 }
  0x3c   :  { %p1526_p13 = scmp.ne.s32.totalorder %s1656_s12, %s1525_s28  ;;  %p1531_p1 = scmp.lt.s32.totalorder %s1525_s28, %s1525_s28 }
  0x3e   :  { %p1532_p2 = por %p1531_p1, %p1530_p0 }
  0x40   :  { %p1533_p3 = pnand %p1532_p2, %p1526_p13 }
  0x42   :  { %1536 = shalt.err (!%p1533_p3)
}
  0x43   :  { %70 = dma.hbm_to_vmem [thread:$0]  %s1870_s6, 2048, %s1656_s12, [#allocation10], %s1569_s17, %s1569_s17, %s1570_s18  }
  0x44   :  { %1559 = dma.done.wait [#allocation4], 2048  }
  0x45   :  { %1560 = vsyncadd [#allocation4], 4294965248 }
  0x46   :  { %1561 = dma.done.wait [#allocation7], 8192  }
  0x47   :  { %1562 = vsyncadd [#allocation7], 4294959104 }
  0x48   :  { %1563 = dma.done.wait [#allocation10], 2048  }
  0x49   :  { %1564 = vsyncadd [#allocation10], 4294965248  ;;  %v92_v0 = vld [vmem:[#allocation3] sm:$0xff]  ;;  %v93_v1 = vld [vmem:[#allocation3 + $0x8] sm:$0xff]  ;;  %v108_v26 = vlaneseq  ;;  %s1573_s20 = smov [#allocation11]  }
  0x4a   :  { %v94_v2 = vld [vmem:[#allocation3 + $0x10] sm:$0xff]  ;;  %v1230_v3 = vpack.c.bf16 %v93_v1, %v92_v0  ;;  %v95_v4 = vld [vmem:[#allocation3 + $0x18] sm:$0xff]  ;;  %v96_v6 = vld [vmem:[#allocation3 + $0x20] sm:$0xff]  ;;  %s896_s21 = sshll.u32 %s1573_s20, 4  ;;  %s897_s21 = int_to_ptr.vmem [resolvable:$true] %s896_s21 }
  0x4b   :  { %v1234_v5 = vpack.c.bf16 %v95_v4, %v94_v2  ;;  %v97_v7 = vld [vmem:[#allocation3 + $0x28] sm:$0xff]  ;;  %v90_v9 = vld [vmem:[%s1864_s0] sm:$0xff]  ;;  %v98_v10 = vld [vmem:[#allocation3 + $0x30] sm:$0xff]  ;;  %v1699_v27 = vshrl.u32 %v108_v26, 7  ;;  %s1537_s1 = scalar_lea.vmem %s897_s21, 256  ;;  %p1542_p5 = scmp.lt.s32.totalorder %s897_s21, %s897_s21 }
  0x4c   :  { %1231 = vmatprep.subr.bf16.mxu0 %v1230_v3  ;;  %v1238_v8 = vpack.c.bf16 %v97_v7, %v96_v6  ;;  %v99_v11 = vld [vmem:[#allocation3 + $0x38] sm:$0xff]  ;;  %1052 = vmatprep.mubr.f32.mxu0 %v90_v9  ;;  %v100_v13 = vld [vmem:[#allocation3 + $0x40] sm:$0xff]  ;;  %v101_v14 = vld [vmem:[#allocation3 + $0x48] sm:$0xff]  ;;  %p1538_p4 = scmp.ne.s32.totalorder %s897_s21, %s1537_s1  ;;  %p1543_p6 = scmp.lt.s32.totalorder %s1537_s1, %s1537_s1 }
  0x4d   :  { %1233 = vmatpush3.bf16.msra.mxu0 %v1230_v3  ;;  %v1242_v12 = vpack.c.bf16 %v99_v11, %v98_v10  ;;  %v1246_v15 = vpack.c.bf16 %v101_v14, %v100_v13  ;;  %v102_v16 = vld [vmem:[#allocation3 + $0x50] sm:$0xff]  ;;  %v103_v17 = vld [vmem:[#allocation3 + $0x58] sm:$0xff]  ;;  %v104_v19 = vld [vmem:[#allocation3 + $0x60] sm:$0xff]  ;;  %v1702_v28 = vsub.s32 0, %v1699_v27  ;;  %v1722_v13 = vsub.s32 1, %v1699_v27 }
  0x4e   :  { %1235 = vmatprep.subr.bf16.mxu0 %v1234_v5  ;;  %v1250_v18 = vpack.c.bf16 %v103_v17, %v102_v16  ;;  %v105_v20 = vld [vmem:[#allocation3 + $0x68] sm:$0xff]  ;;  %v106_v22 = vld [vmem:[#allocation3 + $0x70] sm:$0xff]  ;;  %v107_v23 = vld [vmem:[#allocation3 + $0x78] sm:$0xff]  ;;  %v1725_v14 = vsub.s32 2, %v1699_v27  ;;  %p1544_p7 = por %p1543_p6, %p1542_p5 }
  0x4f   :  { %v1254_v21 = vpack.c.bf16 %v105_v20, %v104_v19  ;;  %v1258_v24 = vpack.c.bf16 %v107_v23, %v106_v22  ;;  %v91_v25 = vld [vmem:[%s1864_s0 + $0x8] sm:$0xff]  ;;  %v1707_v29 = vld [vmem:[%s1866_s2] sm:$0x7]  ;;  %v235_v40 = vld [vmem:[#allocation6 + $0x10] sm:$0xff] }
  0x50   :  { %v111_v30 = vrot.slane %v1707_v29, %v1702_v28  ;;  %v233_v37 = vld [vmem:[#allocation6] sm:$0xff]  ;;  %v234_v38 = vld [vmem:[#allocation6 + $0x8] sm:$0xff]  ;;  %v236_v41 = vld [vmem:[#allocation6 + $0x18] sm:$0xff]  ;;  %v218_v16 = vrot.slane %v1707_v29, %v1722_v13  ;;  %v224_v19 = vrot.slane %v1707_v29, %v1725_v14  ;;  %p1545_p8 = pnand %p1544_p7, %p1538_p4 }
  0x51   :  { %1237 = vmatpush3.bf16.msra.mxu0 %v1234_v5  ;;  %v1262_v39 = vpack.c.bf16 %v234_v38, %v233_v37  ;;  %v1266_v42 = vpack.c.bf16 %v236_v41, %v235_v40  ;;  %v237_v43 = vld [vmem:[#allocation6 + $0x20] sm:$0xff]  ;;  %v238_v44 = vld [vmem:[#allocation6 + $0x28] sm:$0xff]  ;;  %v239_v46 = vld [vmem:[#allocation6 + $0x30] sm:$0xff] }
  0x52   :  { %1239 = vmatprep.subr.bf16.mxu0 %v1238_v8  ;;  %v1270_v45 = vpack.c.bf16 %v238_v44, %v237_v43  ;;  %v240_v47 = vld [vmem:[#allocation6 + $0x38] sm:$0xff]  ;;  %v241_v49 = vld [vmem:[#allocation6 + $0x40] sm:$0xff]  ;;  %v242_v50 = vld [vmem:[#allocation6 + $0x48] sm:$0xff] }
  0x53   :  { %1263 = vmatprep.subr.bf16.mxu1 %v1262_v39  ;;  %v1274_v48 = vpack.c.bf16 %v240_v47, %v239_v46  ;;  %v243_v51 = vld [vmem:[#allocation6 + $0x50] sm:$0xff]  ;;  %v1278_v52 = vpack.c.bf16 %v242_v50, %v241_v49  ;;  %v244_v53 = vld [vmem:[#allocation6 + $0x58] sm:$0xff]  ;;  %v245_v55 = vld [vmem:[#allocation6 + $0x60] sm:$0xff] }
  0x54   :  { %1265 = vmatpush3.bf16.msra.mxu1 %v1262_v39  ;;  %v1282_v54 = vpack.c.bf16 %v244_v53, %v243_v51  ;;  %v246_v56 = vld [vmem:[#allocation6 + $0x68] sm:$0xff]  ;;  %v247_v58 = vld [vmem:[#allocation6 + $0x70] sm:$0xff]  ;;  %v248_v59 = vld [vmem:[#allocation6 + $0x78] sm:$0xff] }
  0x55   :  { %1241 = vmatpush3.bf16.msra.mxu0 %v1238_v8  ;;  %1267 = vmatprep.subr.bf16.mxu1 %v1266_v42  ;;  %v1286_v57 = vpack.c.bf16 %v246_v56, %v245_v55  ;;  %v1290_v60 = vpack.c.bf16 %v248_v59, %v247_v58  ;;  %v1746_v29 = vld [vmem:[%s1869_s5] sm:$0x3f]  ;;  %v250_v40 = vld [vmem:[#allocation8 + $0x8] sm:$0xff]  ;;  %v252_v43 = vld [vmem:[#allocation8 + $0x18] sm:$0xff] }
  0x56   :  { %1243 = vmatprep.subr.bf16.mxu0 %v1242_v12  ;;  %v249_v39 = vld [vmem:[#allocation8] sm:$0xff]  ;;  %v254_v46 = vld [vmem:[#allocation8 + $0x28] sm:$0xff]  ;;  %v256_v49 = vld [vmem:[#allocation8 + $0x38] sm:$0xff] }
  0x57   :  { %v1294_v41 = vpack.c.bf16 %v250_v40, %v249_v39  ;;  %v257_v51 = vld [vmem:[#allocation8 + $0x40] sm:$0xff]  ;;  %v259_v53 = vld [vmem:[#allocation8 + $0x50] sm:$0xff]  ;;  %v260_v55 = vld [vmem:[#allocation8 + $0x58] sm:$0xff] }
  0x58   :  { %1269 = vmatpush3.bf16.msra.mxu1 %v1266_v42  ;;  %v251_v42 = vld [vmem:[#allocation8 + $0x10] sm:$0xff]  ;;  %v1314_v56 = vpack.c.bf16 %v260_v55, %v259_v53  ;;  %v262_v58 = vld [vmem:[#allocation8 + $0x68] sm:$0xff] }
  0x59   :  { %1245 = vmatpush3.bf16.msra.mxu0 %v1242_v12  ;;  %1271 = vmatprep.subr.bf16.mxu1 %v1270_v45  ;;  %v1298_v44 = vpack.c.bf16 %v252_v43, %v251_v42  ;;  %v514_v53 = vld [vmem:[#allocation6 + $0xa8] sm:$0xff]  ;;  %v515_v55 = vld [vmem:[#allocation6 + $0xb0] sm:$0xff] }
  0x5a   :  { %1247 = vmatprep.subr.bf16.mxu0 %v1246_v15 }
  0x5c   :  { %1273 = vmatpush3.bf16.msra.mxu1 %v1270_v45  ;;  %v253_v45 = vld [vmem:[#allocation8 + $0x20] sm:$0xff] }
  0x5d   :  { %1249 = vmatpush3.bf16.msra.mxu0 %v1246_v15  ;;  %1275 = vmatprep.subr.bf16.mxu1 %v1274_v48  ;;  %v1302_v47 = vpack.c.bf16 %v254_v46, %v253_v45  ;;  %v509_v46 = vld [vmem:[#allocation6 + $0x80] sm:$0xff] }
  0x5e   :  { %1251 = vmatprep.subr.bf16.mxu0 %v1250_v18 }
  0x60   :  { %1277 = vmatpush3.bf16.msra.mxu1 %v1274_v48  ;;  %v255_v48 = vld [vmem:[#allocation8 + $0x30] sm:$0xff] }
  0x61   :  { %1253 = vmatpush3.bf16.msra.mxu0 %v1250_v18  ;;  %1279 = vmatprep.subr.bf16.mxu1 %v1278_v52  ;;  %v1306_v50 = vpack.c.bf16 %v256_v49, %v255_v48  ;;  %v511_v49 = vld [vmem:[#allocation6 + $0x90] sm:$0xff] }
  0x62   :  { %1255 = vmatprep.subr.bf16.mxu0 %v1254_v21 }
  0x64   :  { %1281 = vmatpush3.bf16.msra.mxu1 %v1278_v52  ;;  %v258_v52 = vld [vmem:[#allocation8 + $0x48] sm:$0xff] }
  0x65   :  { %1257 = vmatpush3.bf16.msra.mxu0 %v1254_v21  ;;  %1283 = vmatprep.subr.bf16.mxu1 %v1282_v54 }
  0x66   :  { %1259 = vmatprep.subr.bf16.mxu0 %v1258_v24 }
  0x68   :  { %1285 = vmatpush3.bf16.msra.mxu1 %v1282_v54  ;;  %v1310_v54 = vpack.c.bf16 %v258_v52, %v257_v51  ;;  %v513_v52 = vld [vmem:[#allocation6 + $0xa0] sm:$0xff] }
  0x69   :  { %1261 = vmatpush3.bf16.msra.mxu0 %v1258_v24  ;;  %1287 = vmatprep.subr.bf16.mxu1 %v1286_v57 }
  0x6a   :  { %1295 = vmatprep.subr.bf16.mxu0 %v1294_v41 }
  0x6c   :  { %1053 = vmatmul.mubr.f32.vlgmr.msra.gmra.mrb[0].mxu0 %v91_v25  ;;  %1289 = vmatpush3.bf16.msra.mxu1 %v1286_v57  ;;  %v261_v57 = vld [vmem:[#allocation8 + $0x60] sm:$0xff] }
  0x6d   :  { %1291 = vmatprep.subr.bf16.mxu1 %v1290_v60  ;;  %1297 = vmatpush3.bf16.msra.mxu0 %v1294_v41  ;;  %v1318_v59 = vpack.c.bf16 %v262_v58, %v261_v57  ;;  %v517_v58 = vld [vmem:[#allocation6 + $0xc0] sm:$0xff] }
  0x6e   :  { %1299 = vmatprep.subr.bf16.mxu0 %v1298_v44 }
  0x70   :  { %1293 = vmatpush3.bf16.msra.mxu1 %v1290_v60  ;;  %v263_v60 = vld [vmem:[#allocation8 + $0x70] sm:$0xff] }
  0x71   :  { %1301 = vmatpush3.bf16.msra.mxu0 %v1298_v44 }
  0x72   :  { %1303 = vmatprep.subr.bf16.mxu0 %v1302_v47 }
  0x75   :  { %1305 = vmatpush3.bf16.msra.mxu0 %v1302_v47  ;;  %v510_v47 = vld [vmem:[#allocation6 + $0x88] sm:$0xff] }
  0x76   :  { %1307 = vmatprep.subr.bf16.mxu0 %v1306_v50  ;;  %v1326_v48 = vpack.c.bf16 %v510_v47, %v509_v46 }
  0x78   :  { %1327 = vmatprep.subr.bf16.mxu1 %v1326_v48 }
  0x79   :  { %1309 = vmatpush3.bf16.msra.mxu0 %v1306_v50  ;;  %v512_v50 = vld [vmem:[#allocation6 + $0x98] sm:$0xff] }
  0x7a   :  { %1311 = vmatprep.subr.bf16.mxu0 %v1310_v54  ;;  %v1330_v51 = vpack.c.bf16 %v512_v50, %v511_v49 }
  0x7d   :  { %1313 = vmatpush3.bf16.msra.mxu0 %v1310_v54  ;;  %v1334_v54 = vpack.c.bf16 %v514_v53, %v513_v52  ;;  %v528_v53 = vld [vmem:[#allocation8 + $0x90] sm:$0xff] }
  0x7e   :  { %1315 = vmatprep.subr.bf16.mxu0 %v1314_v56 }
  0x81   :  { %1317 = vmatpush3.bf16.msra.mxu0 %v1314_v56  ;;  %v516_v56 = vld [vmem:[#allocation6 + $0xb8] sm:$0xff] }
  0x82   :  { %1319 = vmatprep.subr.bf16.mxu0 %v1318_v59  ;;  %v1338_v57 = vpack.c.bf16 %v516_v56, %v515_v55  ;;  %v530_v56 = vld [vmem:[#allocation8 + $0xa0] sm:$0xff] }
  0x85   :  { %1321 = vmatpush3.bf16.msra.mxu0 %v1318_v59  ;;  %v518_v59 = vld [vmem:[#allocation6 + $0xc8] sm:$0xff] }
 0x13f   :  { %v1054_v31 = vpop.f32.mrb[0].mxu0 }
 0x140   :  { %v178_v32 = vpop.f32.mrb[1].mxu0  ;;  %v1713_v34 = vadd.f32 %v1054_v31, %v111_v30 }
 0x141   :  { %v1711_v33 = vadd.f32 %v178_v32, %v111_v30  ;;  %v269_v32 = vrot.slane %v1746_v29, %v1702_v28 }
 0x142   :  { %v192_v36 = vmul.f32 %v1713_v34, %v1713_v34 }
 0x143   :  { %187 = vadd.xlane.f32.xlu0 %v1711_v33  ;;  %v191_v35 = vmul.f32 %v1711_v33, %v1711_v33 }
 0x145   :  { %193 = vadd.xlane.f32.xlu1 %v191_v35 }
 0x147   :  { %189 = vadd.xlane.f32.xlu0 %v1713_v34 }
 0x149   :  { %195 = vadd.xlane.f32.xlu1 %v192_v36 }
 0x1d0   :  { %v188_v61 = vpop.xlane.xlu0 %187 }
 0x1d1   :  { %v197_v62 = vmul.f32 0.03125, %v188_v61  ;;  %v264_v61 = vld [vmem:[#allocation8 + $0x78] sm:$0xff] }
 0x1d2   :  { %v194_v63 = vpop.xlane.xlu1 %193 }
 0x1d3   :  { %v201_v0 = vmul.f32 %v197_v62, %v197_v62  ;;  %v199_v1 = vmul.f32 0.03125, %v194_v63  ;;  %v207_v15 = vsub.f32 %v1711_v33, %v197_v62  ;;  %v1322_v62 = vpack.c.bf16 %v264_v61, %v263_v60  ;;  %v519_v60 = vld [vmem:[#allocation6 + $0xd0] sm:$0xff] }
 0x1d4   :  { %v190_v2 = vpop.xlane.xlu0 %189  ;;  %v1342_v61 = vpack.c.bf16 %v518_v59, %v517_v58  ;;  %v532_v59 = vld [vmem:[#allocation8 + $0xb0] sm:$0xff] }
 0x1d5   :  { %v203_v3 = vsub.f32 %v199_v1, %v201_v0  ;;  %v198_v4 = vmul.f32 0.03125, %v190_v2  ;;  %1323 = vmatprep.subr.bf16.mxu0 %v1322_v62 }
 0x1d6   :  { %v196_v5 = vpop.xlane.xlu1 %195  ;;  %1325 = vmatpush3.bf16.msra.mxu0 %v1322_v62  ;;  %v520_v62 = vld [vmem:[#allocation6 + $0xd8] sm:$0xff] }
 0x1d7   :  { %v205_v6 = vmax.f32 %v203_v3, 0.0  ;;  %v202_v7 = vmul.f32 %v198_v4, %v198_v4  ;;  %v200_v8 = vmul.f32 0.03125, %v196_v5  ;;  %v208_v20 = vsub.f32 %v1713_v34, %v198_v4 }
 0x1d9   :  { %v209_v9 = vadd.f32 1e-05, %v205_v6  ;;  %v204_v10 = vsub.f32 %v200_v8, %v202_v7 }
 0x1db   :  { %1429 = vrsqrt.f32 %v209_v9  ;;  %v206_v11 = vmax.f32 %v204_v10, 0.0 }
 0x1dd   :  { %v210_v12 = vadd.f32 1e-05, %v206_v11 }
 0x1df   :  { %1431 = vrsqrt.f32 %v210_v12 }
 0x1e5   :  { %v1430_v17 = vpop.eup %1429 }
 0x1e6   :  { %v213_v18 = vmul.f32 %v1430_v17, %v207_v15 }
 0x1e8   :  { %v219_v21 = vmul.f32 %v218_v16, %v213_v18  ;;  %v376_v18 = vrot.slane %v1746_v29, %v1722_v13 }
 0x1e9   :  { %v1432_v22 = vpop.eup %1431 }
 0x1ea   :  { %v1733_v23 = vadd.f32 %v224_v19, %v219_v21  ;;  %v214_v24 = vmul.f32 %v1432_v22, %v208_v20  ;;  %v382_v22 = vrot.slane %v1746_v29, %v1725_v14 }
 0x1ec   :  { %v227_v25 = vmax.f32 %v1733_v23, 0.0  ;;  %v220_v26 = vmul.f32 %v218_v16, %v214_v24 }
 0x1ee   :  { %1087 = vmatprep.mubr.f32.mxu1 %v227_v25  ;;  %v1738_v30 = vadd.f32 %v224_v19, %v220_v26 }
 0x1f0   :  { %v228_v31 = vmax.f32 %v1738_v30, 0.0 }
 0x1f2   :  { %1088 = vmatmul.mubr.f32.vlgmr.msra.gmra.mrb[0].mxu1 %v228_v31 }
 0x1f3   :  { %1329 = vmatpush3.bf16.msra.mxu1 %v1326_v48 }
 0x1f4   :  { %1331 = vmatprep.subr.bf16.mxu1 %v1330_v51 }
 0x1f7   :  { %1333 = vmatpush3.bf16.msra.mxu1 %v1330_v51  ;;  %v526_v51 = vld [vmem:[#allocation8 + $0x80] sm:$0xff] }
 0x1f8   :  { %1335 = vmatprep.subr.bf16.mxu1 %v1334_v54 }
 0x1fb   :  { %1337 = vmatpush3.bf16.msra.mxu1 %v1334_v54  ;;  %v529_v54 = vld [vmem:[#allocation8 + $0x98] sm:$0xff] }
 0x1fc   :  { %1339 = vmatprep.subr.bf16.mxu1 %v1338_v57  ;;  %v1362_v55 = vpack.c.bf16 %v529_v54, %v528_v53  ;;  %v791_v54 = vld [vmem:[#allocation9] sm:$0xff] }
 0x1ff   :  { %1341 = vmatpush3.bf16.msra.mxu1 %v1338_v57  ;;  %v531_v57 = vld [vmem:[#allocation8 + $0xa8] sm:$0xff] }
 0x200   :  { %1343 = vmatprep.subr.bf16.mxu1 %v1342_v61  ;;  %v1366_v58 = vpack.c.bf16 %v531_v57, %v530_v56  ;;  %v793_v56 = vld [vmem:[#allocation9 + $0x10] sm:$0xff]  ;;  %v794_v57 = vld [vmem:[#allocation9 + $0x18] sm:$0xff] }
 0x203   :  { %1345 = vmatpush3.bf16.msra.mxu1 %v1342_v61 }
 0x2c5   :  { %v1089_v33 = vpop.f32.mrb[0].mxu1 }
 0x2c6   :  { %v1750_v34 = vadd.f32 %v1089_v33, %v269_v32  ;;  %v336_v35 = vpop.f32.mrb[1].mxu1 }
 0x2c7   :  { %v1752_v36 = vadd.f32 %v336_v35, %v269_v32 }
 0x2c8   :  { %347 = vadd.xlane.f32.xlu1 %v1750_v34  ;;  %v350_v37 = vmul.f32 %v1750_v34, %v1750_v34 }
 0x2c9   :  { %345 = vadd.xlane.f32.xlu0 %v1752_v36  ;;  %v349_v38 = vmul.f32 %v1752_v36, %v1752_v36 }
 0x2cc   :  { %353 = vadd.xlane.f32.xlu1 %v350_v37 }
 0x2cd   :  { %351 = vadd.xlane.f32.xlu0 %v349_v38 }
 0x355   :  { %v348_v63 = vpop.xlane.xlu1 %347 }
 0x356   :  { %v356_v0 = vmul.f32 0.03125, %v348_v63  ;;  %v346_v1 = vpop.xlane.xlu0 %345  ;;  %v1346_v63 = vpack.c.bf16 %v520_v62, %v519_v60  ;;  %v533_v60 = vld [vmem:[#allocation8 + $0xb8] sm:$0xff]  ;;  %v534_v62 = vld [vmem:[#allocation8 + $0xc0] sm:$0xff] }
 0x357   :  { %v355_v2 = vmul.f32 0.03125, %v346_v1  ;;  %v522_v1 = vld [vmem:[#allocation6 + $0xe8] sm:$0xff]  ;;  %v1370_v61 = vpack.c.bf16 %v533_v60, %v532_v59  ;;  %v795_v59 = vld [vmem:[#allocation9 + $0x20] sm:$0xff] }
 0x358   :  { %v360_v4 = vmul.f32 %v356_v0, %v356_v0  ;;  %v366_v17 = vsub.f32 %v1750_v34, %v356_v0  ;;  %v389_v34 = vsub.s32 3, %v1699_v27  ;;  %v521_v0 = vld [vmem:[#allocation6 + $0xe0] sm:$0xff]  ;;  %1347 = vmatprep.subr.bf16.mxu1 %v1346_v63  ;;  %v796_v60 = vld [vmem:[#allocation9 + $0x28] sm:$0xff] }
 0x359   :  { %v354_v3 = vpop.xlane.xlu1 %353  ;;  %v359_v7 = vmul.f32 %v355_v2, %v355_v2  ;;  %v365_v20 = vsub.f32 %v1752_v36, %v355_v2  ;;  %v1350_v2 = vpack.c.bf16 %v522_v1, %v521_v0  ;;  %1349 = vmatpush3.bf16.msra.mxu1 %v1346_v63  ;;  %v535_v63 = vld [vmem:[#allocation8 + $0xc8] sm:$0xff]  ;;  %v536_v0 = vld [vmem:[#allocation8 + $0xd0] sm:$0xff] }
 0x35a   :  { %v358_v5 = vmul.f32 0.03125, %v354_v3  ;;  %v352_v6 = vpop.xlane.xlu0 %351  ;;  %v390_v36 = vrot.slane %v1746_v29, %v389_v34  ;;  %v523_v3 = vld [vmem:[#allocation6 + $0xf0] sm:$0xff]  ;;  %v1374_v1 = vpack.c.bf16 %v535_v63, %v534_v62  ;;  %v798_v63 = vld [vmem:[#allocation9 + $0x38] sm:$0xff] }
 0x35b   :  { %v357_v8 = vmul.f32 0.03125, %v352_v6  ;;  %1351 = vmatprep.subr.bf16.mxu1 %v1350_v2  ;;  %v797_v62 = vld [vmem:[#allocation9 + $0x30] sm:$0xff] }
 0x35c   :  { %v362_v9 = vsub.f32 %v358_v5, %v360_v4  ;;  %v524_v4 = vld [vmem:[#allocation6 + $0xf8] sm:$0xff] }
 0x35d   :  { %v361_v10 = vsub.f32 %v357_v8, %v359_v7  ;;  %v1354_v5 = vpack.c.bf16 %v524_v4, %v523_v3  ;;  %1353 = vmatpush3.bf16.msra.mxu1 %v1350_v2  ;;  %v537_v2 = vld [vmem:[#allocation8 + $0xd8] sm:$0xff]  ;;  %v538_v4 = vld [vmem:[#allocation8 + $0xe0] sm:$0xff] }
 0x35e   :  { %v364_v11 = vmax.f32 %v362_v9, 0.0  ;;  %v1378_v3 = vpack.c.bf16 %v537_v2, %v536_v0  ;;  %v1402_v0 = vpack.c.bf16 %v798_v63, %v797_v62  ;;  %v800_v2 = vld [vmem:[#allocation9 + $0x48] sm:$0xff] }
 0x35f   :  { %v363_v12 = vmax.f32 %v361_v10, 0.0  ;;  %1355 = vmatprep.subr.bf16.mxu1 %v1354_v5 }
 0x360   :  { %v368_v15 = vadd.f32 1e-05, %v364_v11 }
 0x361   :  { %v367_v16 = vadd.f32 1e-05, %v363_v12  ;;  %1357 = vmatpush3.bf16.msra.mxu1 %v1354_v5  ;;  %v539_v5 = vld [vmem:[#allocation8 + $0xe8] sm:$0xff] }
 0x362   :  { %1433 = vrsqrt.f32 %v368_v15 }
 0x363   :  { %1435 = vrsqrt.f32 %v367_v16 }
 0x36c   :  { %v1434_v19 = vpop.eup %1433 }
 0x36d   :  { %v1436_v21 = vpop.eup %1435  ;;  %v372_v24 = vmul.f32 %v1434_v19, %v366_v17 }
 0x36e   :  { %v371_v26 = vmul.f32 %v1436_v21, %v365_v20 }
 0x36f   :  { %v378_v32 = vmul.f32 %v376_v18, %v372_v24 }
 0x370   :  { %v377_v33 = vmul.f32 %v376_v18, %v371_v26  ;;  %v496_v26 = vsub.s32 4, %v1699_v27 }
 0x371   :  { %v384_v35 = vadd.f32 %v382_v22, %v378_v32  ;;  %v502_v32 = vsub.s32 5, %v1699_v27 }
 0x372   :  { %v383_v37 = vadd.f32 %v382_v22, %v377_v33 }
 0x373   :  { %v386_v39 = vmax.f32 %v384_v35, 0.0  ;;  %v497_v35 = vrot.slane %v1746_v29, %v496_v26 }
 0x374   :  { %v385_v38 = vmax.f32 %v383_v37, 0.0 }
 0x376   :  { %1122 = vmatprep.mubr.f32.mxu0 %v385_v38 }
 0x377   :  { %1123 = vmatmul.mubr.f32.vlgmr.msra.gmra.mrb[2].mxu0 %v386_v39 }
 0x44a   :  { %v1124_v40 = vpop.f32.mrb[2].mxu0 }
 0x44b   :  { %v1770_v41 = vadd.f32 %v1124_v40, %v390_v36  ;;  %v457_v42 = vpop.f32.mrb[3].mxu0 }
 0x44c   :  { %v1772_v43 = vadd.f32 %v457_v42, %v390_v36  ;;  %v503_v36 = vrot.slane %v1746_v29, %v502_v32  ;;  %v1803_v29 = vld [vmem:[%s1869_s5 + $0x8] sm:$0x3f] }
 0x44d   :  { %468 = vadd.xlane.f32.xlu1 %v1770_v41  ;;  %v471_v44 = vmul.f32 %v1770_v41, %v1770_v41 }
 0x44e   :  { %466 = vadd.xlane.f32.xlu0 %v1772_v43  ;;  %v470_v45 = vmul.f32 %v1772_v43, %v1772_v43 }
 0x451   :  { %474 = vadd.xlane.f32.xlu1 %v471_v44 }
 0x452   :  { %472 = vadd.xlane.f32.xlu0 %v470_v45 }
 0x4da   :  { %v469_v6 = vpop.xlane.xlu1 %468 }
 0x4db   :  { %v477_v7 = vmul.f32 0.03125, %v469_v6  ;;  %v467_v8 = vpop.xlane.xlu0 %466  ;;  %v1382_v6 = vpack.c.bf16 %v539_v5, %v538_v4  ;;  %v802_v5 = vld [vmem:[#allocation9 + $0x58] sm:$0xff] }
 0x4dc   :  { %v476_v9 = vmul.f32 0.03125, %v467_v8  ;;  %v541_v8 = vld [vmem:[#allocation8 + $0xf8] sm:$0xff] }
 0x4dd   :  { %v481_v11 = vmul.f32 %v477_v7, %v477_v7  ;;  %v487_v33 = vsub.f32 %v1770_v41, %v477_v7  ;;  %v540_v7 = vld [vmem:[#allocation8 + $0xf0] sm:$0xff] }
 0x4de   :  { %v475_v10 = vpop.xlane.xlu1 %474  ;;  %v480_v16 = vmul.f32 %v476_v9, %v476_v9  ;;  %v486_v38 = vsub.f32 %v1772_v43, %v476_v9  ;;  %v547_v43 = vrot.slane %v1803_v29, %v1702_v28  ;;  %v527_v28 = vld [vmem:[#allocation8 + $0x88] sm:$0xff]  ;;  %v1386_v9 = vpack.c.bf16 %v541_v8, %v540_v7  ;;  %v803_v7 = vld [vmem:[#allocation9 + $0x60] sm:$0xff] }
 0x4df   :  { %v479_v12 = vmul.f32 0.03125, %v475_v10  ;;  %v473_v15 = vpop.xlane.xlu0 %472  ;;  %v1358_v52 = vpack.c.bf16 %v527_v28, %v526_v51  ;;  %v804_v8 = vld [vmem:[#allocation9 + $0x68] sm:$0xff] }
 0x4e0   :  { %v478_v17 = vmul.f32 0.03125, %v473_v15 }
 0x4e1   :  { %v483_v18 = vsub.f32 %v479_v12, %v481_v11  ;;  %1359 = vmatprep.subr.bf16.mxu0 %v1358_v52 }
 0x4e2   :  { %v482_v19 = vsub.f32 %v478_v17, %v480_v16  ;;  %1361 = vmatpush3.bf16.msra.mxu0 %v1358_v52 }
 0x4e3   :  { %v485_v20 = vmax.f32 %v483_v18, 0.0  ;;  %1363 = vmatprep.subr.bf16.mxu0 %v1362_v55 }
 0x4e4   :  { %v484_v21 = vmax.f32 %v482_v19, 0.0 }
 0x4e5   :  { %v489_v22 = vadd.f32 1e-05, %v485_v20 }
 0x4e6   :  { %v488_v24 = vadd.f32 1e-05, %v484_v21  ;;  %1365 = vmatpush3.bf16.msra.mxu0 %v1362_v55 }
 0x4e7   :  { %1437 = vrsqrt.f32 %v489_v22  ;;  %1367 = vmatprep.subr.bf16.mxu0 %v1366_v58 }
 0x4e8   :  { %1439 = vrsqrt.f32 %v488_v24 }
 0x4ea   :  { %1369 = vmatpush3.bf16.msra.mxu0 %v1366_v58  ;;  %v1394_v58 = vpack.c.bf16 %v794_v57, %v793_v56 }
 0x4eb   :  { %1371 = vmatprep.subr.bf16.mxu0 %v1370_v61 }
 0x4ee   :  { %1373 = vmatpush3.bf16.msra.mxu0 %v1370_v61  ;;  %v1398_v61 = vpack.c.bf16 %v796_v60, %v795_v59 }
 0x4ef   :  { %1375 = vmatprep.subr.bf16.mxu0 %v1374_v1 }
 0x4f1   :  { %v1438_v37 = vpop.eup %1437 }
 0x4f2   :  { %v1440_v39 = vpop.eup %1439  ;;  %v493_v40 = vmul.f32 %v1438_v37, %v487_v33  ;;  %1377 = vmatpush3.bf16.msra.mxu0 %v1374_v1  ;;  %v799_v1 = vld [vmem:[#allocation9 + $0x40] sm:$0xff] }
 0x4f3   :  { %v492_v42 = vmul.f32 %v1440_v39, %v486_v38  ;;  %1379 = vmatprep.subr.bf16.mxu0 %v1378_v3  ;;  %v1406_v4 = vpack.c.bf16 %v800_v2, %v799_v1 }
 0x4f4   :  { %v499_v44 = vmul.f32 %v497_v35, %v493_v40 }
 0x4f5   :  { %v498_v45 = vmul.f32 %v497_v35, %v492_v42 }
 0x4f6   :  { %v505_v46 = vadd.f32 %v503_v36, %v499_v44  ;;  %1381 = vmatpush3.bf16.msra.mxu0 %v1378_v3  ;;  %v801_v3 = vld [vmem:[#allocation9 + $0x50] sm:$0xff] }
 0x4f7   :  { %v504_v47 = vadd.f32 %v503_v36, %v498_v45  ;;  %1383 = vmatprep.subr.bf16.mxu0 %v1382_v6  ;;  %v654_v36 = vrot.slane %v1803_v29, %v1722_v13  ;;  %v660_v45 = vrot.slane %v1803_v29, %v1725_v14  ;;  %v668_v13 = vrot.slane %v1803_v29, %v389_v34  ;;  %v792_v34 = vld [vmem:[#allocation9 + $0x8] sm:$0xff] }
 0x4f8   :  { %v1796_v48 = vadd.f32 %v505_v46, %v228_v31  ;;  %v1390_v55 = vpack.c.bf16 %v792_v34, %v791_v54 }
 0x4f9   :  { %v1792_v41 = vadd.f32 %v504_v47, %v227_v25 }
 0x4fa   :  { %1385 = vmatpush3.bf16.msra.mxu0 %v1382_v6  ;;  %1391 = vmatprep.subr.bf16.mxu1 %v1390_v55  ;;  %v1410_v6 = vpack.c.bf16 %v802_v5, %v801_v3 }
 0x4fb   :  { %1157 = vmatprep.mubr.f32.mxu1 %v1792_v41  ;;  %1387 = vmatprep.subr.bf16.mxu0 %v1386_v9 }
 0x4fc   :  { %1158 = vmatmul.mubr.f32.vlgmr.msra.gmra.mrb[2].mxu1 %v1796_v48 }
 0x4fd   :  { %1393 = vmatpush3.bf16.msra.mxu1 %v1390_v55 }
 0x4fe   :  { %1389 = vmatpush3.bf16.msra.mxu0 %v1386_v9  ;;  %1395 = vmatprep.subr.bf16.mxu1 %v1394_v58  ;;  %v1414_v9 = vpack.c.bf16 %v804_v8, %v803_v7 }
 0x501   :  { %1397 = vmatpush3.bf16.msra.mxu1 %v1394_v58 }
 0x502   :  { %1399 = vmatprep.subr.bf16.mxu1 %v1398_v61 }
 0x505   :  { %1401 = vmatpush3.bf16.msra.mxu1 %v1398_v61 }
 0x506   :  { %1403 = vmatprep.subr.bf16.mxu1 %v1402_v0 }
 0x509   :  { %1405 = vmatpush3.bf16.msra.mxu1 %v1402_v0 }
 0x50a   :  { %1407 = vmatprep.subr.bf16.mxu1 %v1406_v4 }
 0x50d   :  { %1409 = vmatpush3.bf16.msra.mxu1 %v1406_v4 }
 0x50e   :  { %1411 = vmatprep.subr.bf16.mxu1 %v1410_v6 }
 0x511   :  { %1413 = vmatpush3.bf16.msra.mxu1 %v1410_v6 }
 0x512   :  { %1415 = vmatprep.subr.bf16.mxu1 %v1414_v9 }
 0x515   :  { %1417 = vmatpush3.bf16.msra.mxu1 %v1414_v9 }
 0x5cf   :  { %v1159_v49 = vpop.f32.mrb[2].mxu1 }
 0x5d0   :  { %v1807_v23 = vadd.f32 %v1159_v49, %v547_v43  ;;  %v614_v25 = vpop.f32.mrb[3].mxu1 }
 0x5d1   :  { %v1809_v50 = vadd.f32 %v614_v25, %v547_v43 }
 0x5d2   :  { %625 = vadd.xlane.f32.xlu1 %v1807_v23  ;;  %v628_v30 = vmul.f32 %v1807_v23, %v1807_v23 }
 0x5d3   :  { %623 = vadd.xlane.f32.xlu0 %v1809_v50  ;;  %v627_v31 = vmul.f32 %v1809_v50, %v1809_v50 }
 0x5d6   :  { %631 = vadd.xlane.f32.xlu1 %v628_v30 }
 0x5d7   :  { %629 = vadd.xlane.f32.xlu0 %v627_v31 }
 0x65f   :  { %v626_v10 = vpop.xlane.xlu1 %625 }
 0x660   :  { %v634_v11 = vmul.f32 0.03125, %v626_v10  ;;  %v624_v12 = vpop.xlane.xlu0 %623  ;;  %v805_v10 = vld [vmem:[#allocation9 + $0x70] sm:$0xff] }
 0x661   :  { %v633_v15 = vmul.f32 0.03125, %v624_v12 }
 0x662   :  { %v638_v17 = vmul.f32 %v634_v11, %v634_v11  ;;  %v644_v39 = vsub.f32 %v1807_v23, %v634_v11  ;;  %v806_v11 = vld [vmem:[#allocation9 + $0x78] sm:$0xff] }
 0x663   :  { %v632_v16 = vpop.xlane.xlu1 %631  ;;  %v637_v20 = vmul.f32 %v633_v15, %v633_v15  ;;  %v643_v42 = vsub.f32 %v1809_v50, %v633_v15  ;;  %v1418_v12 = vpack.c.bf16 %v806_v11, %v805_v10 }
 0x664   :  { %v636_v18 = vmul.f32 0.03125, %v632_v16  ;;  %v630_v19 = vpop.xlane.xlu0 %629 }
 0x665   :  { %v635_v21 = vmul.f32 0.03125, %v630_v19  ;;  %1419 = vmatprep.subr.bf16.mxu1 %v1418_v12 }
 0x666   :  { %v640_v22 = vsub.f32 %v636_v18, %v638_v17  ;;  %1421 = vmatpush3.bf16.msra.mxu1 %v1418_v12 }
 0x667   :  { %v639_v24 = vsub.f32 %v635_v21, %v637_v20 }
 0x668   :  { %v642_v33 = vmax.f32 %v640_v22, 0.0 }
 0x669   :  { %v641_v35 = vmax.f32 %v639_v24, 0.0 }
 0x66a   :  { %v646_v37 = vadd.f32 1e-05, %v642_v33 }
 0x66b   :  { %v645_v38 = vadd.f32 1e-05, %v641_v35 }
 0x66c   :  { %1441 = vrsqrt.f32 %v646_v37 }
 0x66d   :  { %1443 = vrsqrt.f32 %v645_v38 }
 0x676   :  { %v1442_v40 = vpop.eup %1441 }
 0x677   :  { %v1444_v44 = vpop.eup %1443  ;;  %v650_v46 = vmul.f32 %v1442_v40, %v644_v39 }
 0x678   :  { %v649_v47 = vmul.f32 %v1444_v44, %v643_v42  ;;  %v775_v44 = vrot.slane %v1803_v29, %v496_v26  ;;  %v911_v26 = vld [vmem:[%s1871_s7] ss:$0 sm:$0xff] }
 0x679   :  { %v656_v43 = vmul.f32 %v654_v36, %v650_v46 }
 0x67a   :  { %v655_v49 = vmul.f32 %v654_v36, %v649_v47 }
 0x67b   :  { %v662_v25 = vadd.f32 %v660_v45, %v656_v43  ;;  %v781_v43 = vrot.slane %v1803_v29, %v502_v32 }
 0x67c   :  { %v661_v30 = vadd.f32 %v660_v45, %v655_v49 }
 0x67d   :  { %v664_v51 = vmax.f32 %v662_v25, 0.0 }
 0x67e   :  { %v663_v31 = vmax.f32 %v661_v30, 0.0 }
 0x680   :  { %1192 = vmatprep.mubr.f32.mxu0 %v663_v31 }
 0x681   :  { %1193 = vmatmul.mubr.f32.vlgmr.msra.gmra.mrb[4].mxu0 %v664_v51 }
 0x754   :  { %v1194_v23 = vpop.f32.mrb[4].mxu0 }
 0x755   :  { %v1826_v50 = vadd.f32 %v1194_v23, %v668_v13  ;;  %v735_v28 = vpop.f32.mrb[5].mxu0 }
 0x756   :  { %v1828_v52 = vadd.f32 %v735_v28, %v668_v13 }
 0x757   :  { %746 = vadd.xlane.f32.xlu1 %v1826_v50  ;;  %v749_v14 = vmul.f32 %v1826_v50, %v1826_v50 }
 0x758   :  { %744 = vadd.xlane.f32.xlu0 %v1828_v52  ;;  %v748_v53 = vmul.f32 %v1828_v52, %v1828_v52 }
 0x75b   :  { %752 = vadd.xlane.f32.xlu1 %v749_v14 }
 0x75c   :  { %750 = vadd.xlane.f32.xlu0 %v748_v53 }
 0x7e4   :  { %v747_v15 = vpop.xlane.xlu1 %746 }
 0x7e5   :  { %v755_v16 = vmul.f32 0.03125, %v747_v15  ;;  %v745_v17 = vpop.xlane.xlu0 %744 }
 0x7e6   :  { %v754_v18 = vmul.f32 0.03125, %v745_v17 }
 0x7e7   :  { %v759_v20 = vmul.f32 %v755_v16, %v755_v16  ;;  %v765_v42 = vsub.f32 %v1826_v50, %v755_v16 }
 0x7e8   :  { %v753_v19 = vpop.xlane.xlu1 %752  ;;  %v758_v24 = vmul.f32 %v754_v18, %v754_v18  ;;  %v764_v46 = vsub.f32 %v1828_v52, %v754_v18 }
 0x7e9   :  { %v757_v21 = vmul.f32 0.03125, %v753_v19  ;;  %v751_v22 = vpop.xlane.xlu0 %750 }
 0x7ea   :  { %v756_v33 = vmul.f32 0.03125, %v751_v22 }
 0x7eb   :  { %v761_v35 = vsub.f32 %v757_v21, %v759_v20 }
 0x7ec   :  { %v760_v37 = vsub.f32 %v756_v33, %v758_v24 }
 0x7ed   :  { %v763_v38 = vmax.f32 %v761_v35, 0.0 }
 0x7ee   :  { %v762_v39 = vmax.f32 %v760_v37, 0.0 }
 0x7ef   :  { %v767_v36 = vadd.f32 1e-05, %v763_v38 }
 0x7f0   :  { %v766_v40 = vadd.f32 1e-05, %v762_v39 }
 0x7f1   :  { %1445 = vrsqrt.f32 %v767_v36 }
 0x7f2   :  { %1447 = vrsqrt.f32 %v766_v40 }
 0x7fb   :  { %v1446_v45 = vpop.eup %1445 }
 0x7fc   :  { %v1448_v47 = vpop.eup %1447  ;;  %v771_v49 = vmul.f32 %v1446_v45, %v765_v42 }
 0x7fd   :  { %v770_v25 = vmul.f32 %v1448_v47, %v764_v46 }
 0x7fe   :  { %v777_v30 = vmul.f32 %v775_v44, %v771_v49 }
 0x7ff   :  { %v776_v31 = vmul.f32 %v775_v44, %v770_v25 }
 0x800   :  { %v783_v51 = vadd.f32 %v781_v43, %v777_v30 }
 0x801   :  { %v782_v13 = vadd.f32 %v781_v43, %v776_v31 }
 0x802   :  { %v785_v50 = vadd.f32 %v783_v51, %v1796_v48 }
 0x803   :  { %v784_v23 = vadd.f32 %v782_v13, %v1792_v41 }
 0x805   :  { %1227 = vmatprep.mubr.f32.mxu1 %v784_v23 }
 0x806   :  { %1228 = vmatmul.mubr.f32.vlgmr.msra.gmra.mrb[4].mxu1 %v785_v50 }
 0x8d9   :  { %v1229_v27 = vpop.f32.mrb[4].mxu1 }
 0x8da   :  { %v886_v32 = vadd.f32 %v1229_v27, %v911_v26  ;;  %v880_v29 = vpop.f32.mrb[5].mxu1 }
 0x8db   :  { %v881_v28 = vadd.f32 %v911_v26, %v880_v29 }
 0x8dc   :  { %890 = vst [vmem:[#allocation11 + $0x8] sm:$0xff] %v886_v32 }
 0x8dd   :  { %889 = vst [vmem:[#allocation11] sm:$0xff] %v881_v28 }
 0x8de   :  { %1548 = shalt.err (!%p1545_p8)
}
 0x8df   :  { %s1549_s7 = scalar_lea.hbm %s1872_s8, 256 }
 0x8e0   :  { %p1550_p9 = scmp.ne.s32.totalorder %s1872_s8, %s1549_s7  ;;  %p1553_p10 = scmp.lt.u32.totalorder %s1549_s7, %s1872_s8 }
 0x8e2   :  { %p1555_p11 = pnand %p1553_p10, %p1550_p9 }
 0x8e4   :  { %1558 = shalt.err (!%p1555_p11)
}
 0x8e5   :  { %902 = dma.vmem_to_hbm [thread:$0]  %s897_s21, 256, %s1872_s8, [#allocation5], %s1569_s17, %s1569_s17, %s1570_s18  }
 0x8e6   :  { %1565 = dma.done.wait [#allocation5], 256  }
 0x8e7   :  { %1566 = vsyncadd [#allocation5], 4294967040 }
 0x8e8   :  { %906 = vsyncpa [#allocation4], 1 }
 0x8e9   :  { %907 = vsyncpa [#allocation7], 1 }
 0x8ea   :  { %908 = vsyncpa [#allocation10], 1 }
 0x8eb   :  { %909 = vsyncpa [#allocation5], 1 }

</bundles_post_ra>
